<compile_context>
chip_gen: v5e
topology: v5e:2x2
jax: 0.10.0
libtpu: 0.0.40
codegen_flags: <defaults>
</compile_context>

<pallas_src>
import functools

import jax
import jax.numpy as jnp
from jax.experimental import pallas as pl
from jax.experimental.pallas import tpu as pltpu

EPS = 1e-5


def _vmem_capacity_bytes():
    try:
        return int(pltpu.get_tpu_info().vmem_capacity_bytes)
    except Exception:
        return 64 << 20  # conservative fallback (v7x per-core VMEM)


def _pick_tile_rows(rows, lane_cols, itemsize, target_bytes):
    tr = max(1, target_bytes // (lane_cols * itemsize))
    if tr >= rows:
        return rows                       # single full-dim tile (always legal)
    tr = max(8, (tr // 8) * 8)            # keep sublane-aligned tiles
    return rows if tr >= rows else tr


# ---------------------------------------------------------------------------
# C == 1 fast path: the whole tensor is one channel, so view it as a dense
# (rows, lanes) slab (free reshape) and reduce over everything.
# Grid = (phase, row-tile): phase 0 accumulates sum / sum(x^2) (and, on the
# resident path, stashes each tile in a VMEM slab); phase 1 normalizes.
# ---------------------------------------------------------------------------
def _bn_flat_kernel(x_ref, g_ref, b_ref, o_ref, sum_ref, sq_ref, slab_ref, *,
                    count, eps, rows, tile_rows, resident, need_mask):
    p = pl.program_id(0)
    t = pl.program_id(1)

    @pl.when(jnp.logical_and(p == 0, t == 0))
    def _():
        sum_ref[...] = jnp.zeros_like(sum_ref)
        sq_ref[...] = jnp.zeros_like(sq_ref)

    @pl.when(p == 0)
    def _():
        x = x_ref[...]
        if resident:
            slab_ref[t] = x                       # stash for phase 1 (no re-read)
        xf = x.astype(jnp.float32)
        if need_mask:                             # ragged last row-tile
            rid = t * tile_rows + jax.lax.broadcasted_iota(jnp.int32, xf.shape, 0)
            xf = jnp.where(rid < rows, xf, 0.0)
        sum_ref[...] += jnp.sum(xf, axis=(0, 1), keepdims=True)
        sq_ref[...] += jnp.sum(xf * xf, axis=(0, 1), keepdims=True)

    @pl.when(p == 1)
    def _():
        inv_n = 1.0 / count                       # count = real N*H*W
        mean = sum_ref[...] * inv_n               # (1, 1)
        var = jnp.maximum(sq_ref[...] * inv_n - mean * mean, 0.0)   # biased
        inv_std = jax.lax.rsqrt(var + eps)
        scale = inv_std * g_ref[...]              # (1, 1)
        shift = b_ref[...] - mean * scale
        xf = (slab_ref[t] if resident else x_ref[...]).astype(jnp.float32)
        o_ref[...] = (xf * scale + shift).astype(o_ref.dtype)


def _batchnorm_single_channel(x, gamma, beta, *, eps, force_streaming=False):
    N, C, H, W = x.shape
    assert C == 1
    total = N * H * W
    itemsize = x.dtype.itemsize

    # Free, contiguous reshapes only (no extra HBM passes).
    lane_cols = 128 if total % 128 == 0 else W     # fallback: (N*H, W)
    rows = total // lane_cols
    x2 = x.reshape(rows, lane_cols)
    g2 = gamma.reshape(1, 1).astype(jnp.float32)
    b2 = beta.reshape(1, 1).astype(jnp.float32)

    cap = _vmem_capacity_bytes()
    vmem_limit = int(min(cap * 3 // 4, 96 << 20))
    resident_budget = cap // 4
    target_tile = (4 << 20) if cap >= (100 << 20) else (2 << 20)

    tile_rows = _pick_tile_rows(rows, lane_cols, itemsize, target_tile)
    n_tiles = pl.cdiv(rows, tile_rows)
    need_mask = (rows % tile_rows) != 0

    slab_bytes = n_tiles * tile_rows * lane_cols * itemsize
    resident = (not force_streaming) and slab_bytes <= resident_budget

    if resident:
        x_map = lambda p, t: ((1 - p) * t, 0)      # phase 1 parks: no HBM re-read
        slab_shape = (n_tiles, tile_rows, lane_cols)
    else:
        x_map = lambda p, t: (t, 0)                # phase 1 re-reads from HBM
        slab_shape = (1, 8, 128)                   # unused dummy

    kernel = functools.partial(
        _bn_flat_kernel, count=float(total), eps=eps, rows=rows,
        tile_rows=tile_rows, resident=resident, need_mask=need_mask)

    out2 = pl.pallas_call(
        kernel,
        out_shape=jax.ShapeDtypeStruct((rows, lane_cols), x.dtype),
        grid=(2, n_tiles),
        in_specs=[
            pl.BlockSpec((tile_rows, lane_cols), x_map),
            pl.BlockSpec((1, 1), lambda p, t: (0, 0)),
            pl.BlockSpec((1, 1), lambda p, t: (0, 0)),
        ],
        # Output parked at tile 0 during phase 0 (never written back there);
        # phase 1 writes each tile exactly once before it is retired.
        out_specs=pl.BlockSpec((tile_rows, lane_cols), lambda p, t: (p * t, 0)),
        scratch_shapes=[
            pltpu.VMEM((1, 1), jnp.float32),
            pltpu.VMEM((1, 1), jnp.float32),
            pltpu.VMEM(slab_shape, x.dtype),
        ],
        compiler_params=pltpu.CompilerParams(
            dimension_semantics=("arbitrary", "arbitrary"),
            vmem_limit_bytes=vmem_limit),
    )(x2, g2, b2)

    return out2.reshape(N, C, H, W)


# ---------------------------------------------------------------------------
# General C path: (N, C, H*W) layout (free reshape), per-channel statistics.
# Grid = (channel-block, phase, N, HW-tile); streaming two-pass.
# ---------------------------------------------------------------------------
def _bn_nchw_kernel(x_ref, g_ref, b_ref, o_ref, sum_ref, sq_ref, *,
                    count, eps, hw, tile_hw, need_mask):
    p = pl.program_id(1)
    n = pl.program_id(2)
    t = pl.program_id(3)
    first = jnp.logical_and(n == 0, t == 0)

    @pl.when(jnp.logical_and(p == 0, first))
    def _():
        sum_ref[...] = jnp.zeros_like(sum_ref)
        sq_ref[...] = jnp.zeros_like(sq_ref)

    @pl.when(p == 0)
    def _():
        xf = x_ref[...].astype(jnp.float32)        # (TC, THW)
        if need_mask:                              # ragged last HW tile
            cid = t * tile_hw + jax.lax.broadcasted_iota(jnp.int32, xf.shape, 1)
            xf = jnp.where(cid < hw, xf, 0.0)
        sum_ref[...] += jnp.sum(xf, axis=-1, keepdims=True)
        sq_ref[...] += jnp.sum(xf * xf, axis=-1, keepdims=True)

    @pl.when(p == 1)
    def _():
        inv_n = 1.0 / count
        mean = sum_ref[...] * inv_n                # (TC, 1)
        var = jnp.maximum(sq_ref[...] * inv_n - mean * mean, 0.0)
        inv_std = jax.lax.rsqrt(var + eps)
        scale = inv_std * g_ref[...]
        shift = b_ref[...] - mean * scale
        xf = x_ref[...].astype(jnp.float32)
        o_ref[...] = (xf * scale + shift).astype(o_ref.dtype)


def _batchnorm_multi_channel(x, gamma, beta, *, eps):
    N, C, H, W = x.shape
    HW = H * W
    itemsize = x.dtype.itemsize

    x3 = x.reshape(N, C, HW)                       # free reshape, no transpose
    g2 = gamma.reshape(C, 1).astype(jnp.float32)
    b2 = beta.reshape(C, 1).astype(jnp.float32)

    TC = 8 if C % 8 == 0 else C
    cap = _vmem_capacity_bytes()
    vmem_limit = int(min(cap * 3 // 4, 96 << 20))
    target_tile = (4 << 20) if cap >= (100 << 20) else (2 << 20)

    if HW % 128 == 0:
        thw = max(128, (target_tile // (TC * itemsize)) // 128 * 128)
        thw = min(thw, HW)
    else:
        thw = HW                                   # full dim (always legal)
    n_hw_tiles = pl.cdiv(HW, thw)
    need_mask = (HW % thw) != 0

    kernel = functools.partial(_bn_nchw_kernel, count=float(N * HW), eps=eps,
                               hw=HW, tile_hw=thw, need_mask=need_mask)

    out3 = pl.pallas_call(
        kernel,
        out_shape=jax.ShapeDtypeStruct((N, C, HW), x.dtype),
        grid=(C // TC, 2, N, n_hw_tiles),
        in_specs=[
            pl.BlockSpec((None, TC, thw), lambda c, p, n, t: (n, c, t)),
            pl.BlockSpec((TC, 1), lambda c, p, n, t: (c, 0)),
            pl.BlockSpec((TC, 1), lambda c, p, n, t: (c, 0)),
        ],
        out_specs=pl.BlockSpec((None, TC, thw),
                               lambda c, p, n, t: (n * p, c, t * p)),
        scratch_shapes=[pltpu.VMEM((TC, 1), jnp.float32),
                        pltpu.VMEM((TC, 1), jnp.float32)],
        compiler_params=pltpu.CompilerParams(
            dimension_semantics=("parallel", "arbitrary", "arbitrary", "arbitrary"),
            vmem_limit_bytes=vmem_limit),
    )(x3, g2, b2)

    return out3.reshape(N, C, H, W)


def batchnorm2d(x, gamma, beta, *, eps=EPS, force_streaming=False):
    """Training-mode BatchNorm2d forward (batch stats, biased variance)."""
    N, C, H, W = x.shape
    if C == 1:
        return _batchnorm_single_channel(x, gamma, beta, eps=eps,
                                         force_streaming=force_streaming)
    return _batchnorm_multi_channel(x, gamma, beta, eps=eps)


if __name__ == "__main__":
    key = jax.random.PRNGKey(0)

    def ref_bn(x, gamma, beta, eps=EPS):
        mean = jnp.mean(x, axis=(0, 2, 3), keepdims=True)
        var = jnp.mean((x - mean) ** 2, axis=(0, 2, 3), keepdims=True)
        C = x.shape[1]
        return ((x - mean) * jax.lax.rsqrt(var + eps) * gamma.reshape(1, C, 1, 1)
                + beta.reshape(1, C, 1, 1))

    # Module under test: nn.BatchNorm2d(1), training mode, default affine init
    # (weight = 1, bias = 0), eps = 1e-5.
    N, C, H, W = 2, 1, 16, 16
    x = jax.random.normal(key, (N, C, H, W), dtype=jnp.float32)
    gamma = jnp.ones((C,), jnp.float32)
    beta = jnp.zeros((C,), jnp.float32)

    out = jax.block_until_ready(batchnorm2d(x, gamma, beta))
    assert out.shape == x.shape and out.dtype == x.dtype
    assert jnp.allclose(out, ref_bn(x, gamma, beta), atol=1e-5, rtol=1e-5), \
        "resident path mismatch"

    # Exercise the streaming (large-tensor) fallback on the same data.
    out_s = jax.block_until_ready(
        batchnorm2d(x, gamma, beta, force_streaming=True))
    assert jnp.allclose(out_s, ref_bn(x, gamma, beta), atol=1e-5, rtol=1e-5), \
        "streaming path mismatch"

    # Sanity-check the general multi-channel kernel as well (not the module's
    # config, but keeps the C > 1 code path honest).
    x4 = jax.random.normal(jax.random.PRNGKey(1), (2, 4, 8, 16), jnp.float32)
    g4 = jnp.linspace(0.5, 1.5, 4, dtype=jnp.float32)
    b4 = jnp.linspace(-0.2, 0.2, 4, dtype=jnp.float32)
    out4 = jax.block_until_ready(batchnorm2d(x4, g4, b4))
    assert jnp.allclose(out4, ref_bn(x4, g4, b4), atol=1e-5, rtol=1e-5), \
        "multi-channel path mismatch"

    print("KERNEL_OK")
</pallas_src>

<mosaic_0001>
module attributes {stable_mosaic.version = 11 : i64} {
  func.func @_bn_flat_kernel(%arg0: i32, %arg1: i32, %arg2: memref<4x128xf32, #tpu.memory_space<vmem>>, %arg3: memref<1x1xf32, #tpu.memory_space<vmem>>, %arg4: memref<1x1xf32, #tpu.memory_space<vmem>>, %arg5: memref<4x128xf32, #tpu.memory_space<vmem>>, %arg6: memref<1x1xf32, #tpu.memory_space<vmem>>, %arg7: memref<1x1xf32, #tpu.memory_space<vmem>>, %arg8: memref<1x4x128xf32, #tpu.memory_space<vmem>>) attributes {dimension_semantics = [#tpu.dimension_semantics<arbitrary>, #tpu.dimension_semantics<arbitrary>], iteration_bounds = array<i64: 2, 1>, scalar_prefetch = 0 : i64, scratch_operands = 3 : i64, tpu.core_type = #tpu.core_type<tc>, window_params = [{transform_indices = @transform_0, window_bounds = array<i64: 4, 128>}, {pipeline_mode = #tpu.pipeline_mode<synchronous>, transform_indices = @transform_1, window_bounds = array<i64: 1, 1>}, {pipeline_mode = #tpu.pipeline_mode<synchronous>, transform_indices = @transform_2, window_bounds = array<i64: 1, 1>}, {transform_indices = @transform_3, window_bounds = array<i64: 4, 128>}]} {
    %c0_i32 = arith.constant 0 : i32
    %0 = arith.cmpi eq, %arg0, %c0_i32 : i32
    %c0_i32_0 = arith.constant 0 : i32
    %1 = arith.cmpi eq, %arg1, %c0_i32_0 : i32
    %2 = arith.andi %0, %1 : i1
    %3 = arith.extui %2 : i1 to i32
    %c0_i32_1 = arith.constant 0 : i32
    %4 = arith.cmpi ne, %3, %c0_i32_1 : i32
    scf.if %4 {
      %cst = arith.constant 0.000000e+00 : f32
      %11 = vector.broadcast %cst : f32 to vector<1x1xf32>
      %c0 = arith.constant 0 : index
      %c0_5 = arith.constant 0 : index
      %12 = vector.load %arg6[%c0, %c0_5] : memref<1x1xf32, #tpu.memory_space<vmem>>, vector<1x1xf32>
      tpu.vector_store %arg6[%c0, %c0_5], %11 {strides = array<i32>} : memref<1x1xf32, #tpu.memory_space<vmem>>, vector<1x1xf32>,
      %cst_6 = arith.constant 0.000000e+00 : f32
      %13 = vector.broadcast %cst_6 : f32 to vector<1x1xf32>
      %c0_7 = arith.constant 0 : index
      %c0_8 = arith.constant 0 : index
      %14 = vector.load %arg7[%c0_7, %c0_8] : memref<1x1xf32, #tpu.memory_space<vmem>>, vector<1x1xf32>
      tpu.vector_store %arg7[%c0_7, %c0_8], %13 {strides = array<i32>} : memref<1x1xf32, #tpu.memory_space<vmem>>, vector<1x1xf32>,
    } else {
    }
    %c0_i32_2 = arith.constant 0 : i32
    %5 = arith.cmpi eq, %arg0, %c0_i32_2 : i32
    %6 = arith.extui %5 : i1 to i32
    %c0_i32_3 = arith.constant 0 : i32
    %7 = arith.cmpi ne, %6, %c0_i32_3 : i32
    scf.if %7 {
      %c0 = arith.constant 0 : index
      %c0_5 = arith.constant 0 : index
      %11 = vector.load %arg2[%c0, %c0_5] : memref<4x128xf32, #tpu.memory_space<vmem>>, vector<4x128xf32>
      %12 = arith.index_cast %arg1 : i32 to index
      %c0_6 = arith.constant 0 : index
      %c0_7 = arith.constant 0 : index
      %13 = vector.load %arg8[%12, %c0_6, %c0_7] : memref<1x4x128xf32, #tpu.memory_space<vmem>>, vector<1x4x128xf32>
      %14 = vector.shape_cast %13 : vector<1x4x128xf32> to vector<4x128xf32>
      %15 = vector.shape_cast %11 : vector<4x128xf32> to vector<1x4x128xf32>
      tpu.vector_store %arg8[%12, %c0_6, %c0_7], %15 {strides = array<i32>} : memref<1x4x128xf32, #tpu.memory_space<vmem>>, vector<1x4x128xf32>,
      %c0_8 = arith.constant 0 : index
      %c0_9 = arith.constant 0 : index
      %16 = vector.load %arg6[%c0_8, %c0_9] : memref<1x1xf32, #tpu.memory_space<vmem>>, vector<1x1xf32>
      %17 = vector.shape_cast %11 : vector<4x128xf32> to vector<1x4x128xf32>
      %cst = arith.constant dense<0.000000e+00> : vector<1xf32>
      %18 = vector.multi_reduction <add>, %17, %cst [1, 2] : vector<1x4x128xf32> to vector<1xf32>
      %19 = vector.shape_cast %18 : vector<1xf32> to vector<1x1x1xf32>
      %20 = vector.extract %19[0, 0, 0] : f32 from vector<1x1x1xf32>
      %21 = vector.broadcast %20 : f32 to vector<1x1xf32>
      %22 = arith.addf %16, %21 : vector<1x1xf32>
      %c0_10 = arith.constant 0 : index
      %c0_11 = arith.constant 0 : index
      %23 = vector.load %arg6[%c0_10, %c0_11] : memref<1x1xf32, #tpu.memory_space<vmem>>, vector<1x1xf32>
      tpu.vector_store %arg6[%c0_10, %c0_11], %22 {strides = array<i32>} : memref<1x1xf32, #tpu.memory_space<vmem>>, vector<1x1xf32>,
      %c0_12 = arith.constant 0 : index
      %c0_13 = arith.constant 0 : index
      %24 = vector.load %arg7[%c0_12, %c0_13] : memref<1x1xf32, #tpu.memory_space<vmem>>, vector<1x1xf32>
      %25 = arith.mulf %11, %11 : vector<4x128xf32>
      %26 = vector.shape_cast %25 : vector<4x128xf32> to vector<1x4x128xf32>
      %cst_14 = arith.constant dense<0.000000e+00> : vector<1xf32>
      %27 = vector.multi_reduction <add>, %26, %cst_14 [1, 2] : vector<1x4x128xf32> to vector<1xf32>
      %28 = vector.shape_cast %27 : vector<1xf32> to vector<1x1x1xf32>
      %29 = vector.extract %28[0, 0, 0] : f32 from vector<1x1x1xf32>
      %30 = vector.broadcast %29 : f32 to vector<1x1xf32>
      %31 = arith.addf %24, %30 : vector<1x1xf32>
      %c0_15 = arith.constant 0 : index
      %c0_16 = arith.constant 0 : index
      %32 = vector.load %arg7[%c0_15, %c0_16] : memref<1x1xf32, #tpu.memory_space<vmem>>, vector<1x1xf32>
      tpu.vector_store %arg7[%c0_15, %c0_16], %31 {strides = array<i32>} : memref<1x1xf32, #tpu.memory_space<vmem>>, vector<1x1xf32>,
    } else {
    }
    %c1_i32 = arith.constant 1 : i32
    %8 = arith.cmpi eq, %arg0, %c1_i32 : i32
    %9 = arith.extui %8 : i1 to i32
    %c0_i32_4 = arith.constant 0 : i32
    %10 = arith.cmpi ne, %9, %c0_i32_4 : i32
    scf.if %10 {
      %c0 = arith.constant 0 : index
      %c0_5 = arith.constant 0 : index
      %11 = vector.load %arg6[%c0, %c0_5] : memref<1x1xf32, #tpu.memory_space<vmem>>, vector<1x1xf32>
      %cst = arith.constant 0.001953125 : f32
      %12 = vector.broadcast %cst : f32 to vector<1x1xf32>
      %13 = arith.mulf %11, %12 : vector<1x1xf32>
      %c0_6 = arith.constant 0 : index
      %c0_7 = arith.constant 0 : index
      %14 = vector.load %arg7[%c0_6, %c0_7] : memref<1x1xf32, #tpu.memory_space<vmem>>, vector<1x1xf32>
      %cst_8 = arith.constant 0.001953125 : f32
      %15 = vector.broadcast %cst_8 : f32 to vector<1x1xf32>
      %16 = arith.mulf %14, %15 : vector<1x1xf32>
      %17 = arith.mulf %13, %13 : vector<1x1xf32>
      %18 = arith.subf %16, %17 : vector<1x1xf32>
      %cst_9 = arith.constant 0.000000e+00 : f32
      %19 = vector.broadcast %cst_9 : f32 to vector<1x1xf32>
      %20 = arith.maximumf %18, %19 : vector<1x1xf32>
      %cst_10 = arith.constant 9.99999974E-6 : f32
      %21 = vector.broadcast %cst_10 : f32 to vector<1x1xf32>
      %22 = arith.addf %20, %21 : vector<1x1xf32>
      %23 = math.rsqrt %22 : vector<1x1xf32>
      %c0_11 = arith.constant 0 : index
      %c0_12 = arith.constant 0 : index
      %24 = vector.load %arg3[%c0_11, %c0_12] : memref<1x1xf32, #tpu.memory_space<vmem>>, vector<1x1xf32>
      %25 = arith.mulf %23, %24 : vector<1x1xf32>
      %c0_13 = arith.constant 0 : index
      %c0_14 = arith.constant 0 : index
      %26 = vector.load %arg4[%c0_13, %c0_14] : memref<1x1xf32, #tpu.memory_space<vmem>>, vector<1x1xf32>
      %27 = arith.mulf %13, %25 : vector<1x1xf32>
      %28 = arith.subf %26, %27 : vector<1x1xf32>
      %29 = arith.index_cast %arg1 : i32 to index
      %c0_15 = arith.constant 0 : index
      %c0_16 = arith.constant 0 : index
      %30 = vector.load %arg8[%29, %c0_15, %c0_16] : memref<1x4x128xf32, #tpu.memory_space<vmem>>, vector<1x4x128xf32>
      %31 = vector.shape_cast %30 : vector<1x4x128xf32> to vector<4x128xf32>
      %32 = vector.broadcast %25 : vector<1x1xf32> to vector<4x128xf32>
      %33 = arith.mulf %31, %32 : vector<4x128xf32>
      %34 = vector.broadcast %28 : vector<1x1xf32> to vector<4x128xf32>
      %35 = arith.addf %33, %34 : vector<4x128xf32>
      %c0_17 = arith.constant 0 : index
      %c0_18 = arith.constant 0 : index
      %36 = vector.load %arg5[%c0_17, %c0_18] : memref<4x128xf32, #tpu.memory_space<vmem>>, vector<4x128xf32>
      tpu.vector_store %arg5[%c0_17, %c0_18], %35 {strides = array<i32>} : memref<4x128xf32, #tpu.memory_space<vmem>>, vector<4x128xf32>,
    } else {
    }
    return
  }
  func.func @transform_0(%arg0: i32, %arg1: i32) -> (i32, i32) {
    %c1_i32 = arith.constant 1 : i32
    %0 = arith.subi %c1_i32, %arg0 : i32
    %1 = arith.muli %0, %arg1 : i32
    %c0_i32 = arith.constant 0 : i32
    %c0_i32_0 = arith.constant 0 : i32
    return %1, %c0_i32 : i32, i32
  }
  func.func @transform_1(%arg0: i32, %arg1: i32) -> (i32, i32) {
    %c0_i32 = arith.constant 0 : i32
    %c0_i32_0 = arith.constant 0 : i32
    %c0_i32_1 = arith.constant 0 : i32
    return %c0_i32, %c0_i32_0 : i32, i32
  }
  func.func @transform_2(%arg0: i32, %arg1: i32) -> (i32, i32) {
    %c0_i32 = arith.constant 0 : i32
    %c0_i32_0 = arith.constant 0 : i32
    %c0_i32_1 = arith.constant 0 : i32
    return %c0_i32, %c0_i32_0 : i32, i32
  }
  func.func @transform_3(%arg0: i32, %arg1: i32) -> (i32, i32) {
    %0 = arith.muli %arg0, %arg1 : i32
    %c0_i32 = arith.constant 0 : i32
    %c0_i32_0 = arith.constant 0 : i32
    return %0, %c0_i32 : i32, i32
  }
}

</mosaic_0001>

<bundles_post_ra>
// kernel: tpu_custom_call.1
= control target key start
LH: loop header
LB: loop body
LE: loop exit
PB: predicated region body
PF: predicated region fallthrough
CT: control target
= control target key end

     0   :  { %s568_s0 = inlined_call_operand.vmem [shape: f32[4,128], index: 0, kind: input, shape index: {}]   ;;  %s569_s1 = inlined_call_operand.<no memory space> [shape: f32[1,1], index: 1, kind: input, shape index: {}]   ;;  %s570_s3 = inlined_call_operand.hbm [shape: f32[4,128], index: 3, kind: output, shape index: {}]   ;;  %s571_s2 = inlined_call_operand.<no memory space> [shape: f32[1,1], index: 2, kind: input, shape index: {}]  }
   0x1   :  { %v8_v0 = vstv %s569_s1  ;;  %v10_v1 = vstv %s571_s2 }
   0x2   :  { %9 = vst [vmem:[#allocation5] sm:$0x1] %v8_v0 }
   0x3   :  { %11 = vst [vmem:[#allocation6] sm:$0x1] %v10_v1 }
   0x4   :  { %12 = vsyncpa [#allocation8], 0 }
   0x5   :  { %14 = vsyncpa [#allocation8 + $0x1], 0  ;;  %s523_s16 = smov 0   ;;  %s525_s17 = smov 0  }
   0x6   :  { %s527_s18 = smov 0  }
   0x7 LB: > { %s379_s1 = sadd.s32 4294967295, %s492_s18   ;;  %s380_s2 = sadd.s32 4294967294, %s492_s18   ;;  %s492_s18 = sphi %s527_s18, %s20_s18   ;;  %s488_s17 = sphi %s525_s17, %s573_s17   ;;  %s484_s16 = sphi %s523_s16, %s572_s16  }
   0x8   : > { %s32_s19 = sadd.s32 1, %s488_s17  ;;  %p384_p0 = scmp.ge.s32.totalorder %s492_s18, 1 }
   0x9   : > { %p34_p1 = scmp.ge.s32.totalorder %s32_s19, 2  ;;  %p165_p2 = scmp.lt.s32.totalorder %s492_s18, 3 }
   0xb   : > { %s575_s19 = smov (%p34_p1, %s32_s19), 0  ;;  %p166_p3 = pnand %p384_p0, %p165_p2 }
   0xc   : > { %p199_p4 = scmp.eq.s32.totalorder (!%p166_p3), %s484_s16, 0 }
   0xd   : > { %169 = sbr.rel (%p166_p3) target bundleno = 392 (0x188), region = 32 }
  0x12   : > { %204 = sbr.rel (!%p199_p4) target bundleno = 23 (0x17), region = 36  ;;  %vm205_vm0 = vcmask (%p199_p4), 0   ;;  %v494_v2 = vmov (%p199_p4), 0.0  }
  0x13   : > { %206 = vst.msk [vmem:[#allocation2] sm:$0x1] (%p199_p4), %vm205_vm0, %v494_v2 }
  0x14   : > { %207 = vst.msk [vmem:[#allocation3] sm:$0x1] (%p199_p4), %vm205_vm0, %v494_v2 }
  0x17 PF: > { %p386_p5 = scmp.ne.s32.totalorder %s484_s16, 0 }
  0x19   : > { %210 = sbr.rel (%p386_p5) target bundleno = 222 (0xde), region = 40 }
  0x1e   : > { %v211_v3 = vld [vmem:[%s568_s0] sm:$0xf]  ;;  %vm216_vm1 = vcmask 1043456   ;;  %vm229_vm2 = vcmask 0  }
  0x1f   : > { %v217_v4 = vsel %vm216_vm1, %v211_v3, 0.0  ;;  %214 = vst [vmem:[#allocation4] sm:$0xf] %v211_v3  ;;  %v232_v5 = vmul.f32 %v211_v3, %v211_v3  ;;  %v215_v21 = vld [vmem:[#allocation2] sm:$0x1] }
  0x20   : > { %218 = vadd.xlane.f32.xlu0 %v217_v4  ;;  %v231_v24 = vld [vmem:[#allocation3] sm:$0x1] }
  0x21   : > { %v233_v6 = vsel %vm216_vm1, %v232_v5, 0.0 }
  0x28   : > { %234 = vadd.xlane.f32.xlu0 %v233_v6 }
  0x93   : > { %v219_v7 = vpop.xlane.xlu0 %218 }
  0x94   : > { %v220_v8 = vrot.slane %v219_v7, 4 }
  0x96   : > { %v221_v9 = vadd.f32 %v220_v8, %v219_v7 }
  0x98   : > { %v222_v10 = vrot.slane %v221_v9, 2 }
  0x9a   : > { %v223_v11 = vadd.f32 %v222_v10, %v221_v9 }
  0x9b   : > { %v235_v12 = vpop.xlane.xlu0 %234 }
  0x9c   : > { %v236_v13 = vrot.slane %v235_v12, 4  ;;  %v224_v14 = vrot.slane %v223_v11, 1 }
  0x9e   : > { %v237_v15 = vadd.f32 %v236_v13, %v235_v12  ;;  %v225_v16 = vadd.f32 %v224_v14, %v223_v11 }
  0xa0   : > { %v238_v17 = vrot.slane %v237_v15, 2  ;;  %393 = vpush %v225_v16 }
  0xa2   : > { %v239_v18 = vadd.f32 %v238_v17, %v237_v15 }
  0xa4   : > { %v240_v19 = vrot.slane %v239_v18, 1 }
  0xa6   : > { %v241_v20 = vadd.f32 %v240_v19, %v239_v18 }
  0xa8   : > { %395 = vpush %v241_v20 }
  0xd1   : > { %s394_s22 = spop %393 }
  0xd2   : > { %v227_v22 = vstv %s394_s22 }
  0xd3   : > { %v228_v23 = vadd.f32 %v227_v22, %v215_v21 }
  0xd5   : > { %230 = vst.msk [vmem:[#allocation2] sm:$0x1] %vm229_vm2, %v228_v23 }
  0xd9   : > { %s396_s23 = spop %395 }
  0xda   : > { %v243_v25 = vstv %s396_s23 }
  0xdb   : > { %v244_v26 = vadd.f32 %v243_v25, %v231_v24 }
  0xdd   : > { %245 = vst.msk [vmem:[#allocation3] sm:$0x1] %vm229_vm2, %v244_v26 }
  0xde PF: > { %p387_p6 = scmp.ne.s32.totalorder %s484_s16, 1 }
  0xe0   : > { %249 = sbr.rel (%p387_p6) target bundleno = 388 (0x184), region = 44 }
  0xe5   : > { %v250_v27 = vld [vmem:[#allocation2] sm:$0x1]  ;;  %v252_v28 = vld [vmem:[#allocation3] sm:$0x1]  ;;  %v495_v29 = vmov 0  }
  0xe6   : > { %435 = vset.pattern.permute.xlu0 %v495_v29  ;;  %v251_v30 = vmul.f32 0.001953125, %v250_v27  ;;  %v253_v31 = vmul.f32 0.001953125, %v252_v28  ;;  %v268_v42 = vld [vmem:[#allocation5] sm:$0x1]  ;;  %v270_v45 = vld [vmem:[#allocation6] sm:$0x1] }
  0xe7   : > { %v275_v51 = vld [vmem:[#allocation4] sm:$0xf] }
  0xe8   : > { %v254_v32 = vmul.f32 %v251_v30, %v251_v30 }
  0xea   : > { %v255_v33 = vsub.f32 %v253_v31, %v254_v32 }
  0xec   : > { %v256_v34 = vmax.f32 %v255_v33, 0.0 }
  0xee   : > { %v257_v35 = vadd.f32 1e-05, %v256_v34 }
  0xf0   : > { %436 = vrsqrt.f32 %v257_v35  ;;  %vm264_vm3 = vweird.f32 %v257_v35 }
  0xf6   : > { %v437_v36 = vpop.eup %436 }
  0xf7   : > { %v259_v37 = vmul.f32 %v437_v36, %v257_v35  ;;  %vm265_vm4 = vweird.f32 %v437_v36 }
  0xf8   : > { %vm266_vm5 = vmor %vm264_vm3, %vm265_vm4 }
  0xf9   : > { %v260_v38 = vmul.f32 %v437_v36, %v259_v37 }
  0xfb   : > { %v261_v39 = vmul.f32 0.5, %v260_v38 }
  0xfd   : > { %v262_v40 = vsub.f32 1.5, %v261_v39 }
  0xff   : > { %v263_v41 = vmul.f32 %v437_v36, %v262_v40 }
 0x101   : > { %v267_v43 = vsel %vm266_vm5, %v437_v36, %v263_v41 }
 0x102   : > { %v269_v44 = vmul.f32 %v268_v42, %v267_v43 }
 0x104   : > { %v277_v46 = vperm.slane %v269_v44, 0  ;;  %v271_v47 = vmul.f32 %v269_v44, %v251_v30 }
 0x106   : > { %279 = vperm.xlu0 %435, %v277_v46   ;;  %v272_v48 = vsub.f32 %v270_v45, %v271_v47 }
 0x108   : > { %v284_v49 = vperm.slane %v272_v48, 0 }
 0x10e   : > { %286 = vperm.xlu0 %435, %v284_v49  }
 0x178   : > { %v280_v50 = vpop.permute.xlu0 %279 }
 0x179   : > { %v282_v52 = vmul.f32 %v280_v50, %v275_v51 }
 0x180   : > { %v287_v53 = vpop.permute.xlu0 %286 }
 0x181   : > { %v289_v54 = vadd.f32 %v287_v53, %v282_v52 }
 0x183   : > { %290 = vst [vmem:[#allocation7] sm:$0xf] %v289_v54 }
 0x184 PF: > { %p405_p7 = scmp.eq.s32.totalorder %s379_s1, 1  ;;  %s307_s26 = sshll.u32 %s570_s3, 4  ;;  %s308_s26 = int_to_ptr.hbm [resolvable:$true] %s307_s26 }
 0x185   : > { %s496_s27 = smov [#allocation7]  }
 0x186   : > { %s305_s28 = sshll.u32 %s496_s27, 4  ;;  %s306_s28 = int_to_ptr.vmem [resolvable:$true] %s305_s28 }
 0x187   : > { %398 = dma.vmem_to_hbm [thread:$0]  (%p405_p7), %s306_s28, 64, %s308_s26, [#allocation8]  }
 0x188 PF: > { %p406_p8 = scmp.ge.s32.totalorder %s492_s18, 2  ;;  %p407_p9 = scmp.eq.s32.totalorder %s380_s2, 1 }
 0x18a   : > { %p402_p10 = pnand %p407_p9, %p406_p8 }
 0x18c   : > { %p403_p11 = pneg %p402_p10 }
 0x18e   : > { %479 = dma.done.wait (%p403_p11), [#allocation8], 64  }
 0x18f   : > { %481 = vsyncadd (%p403_p11), [#allocation8], 4294967232  ;;  %s20_s18 = sadd.s32 1, %s492_s18   ;;  %s572_s16 = smov %s488_s17 }
 0x190   : > { %p17_p12 = scmp.ge.s32.totalorder %s20_s18, 4   ;;  %s573_s17 = smov %s575_s19 }
 0x192   :  { %19 = sbr.rel (!%p17_p12) target bundleno = 7 (0x7), region = 81 }
 0x197   :  { %326 = vsyncpa [#allocation8], 1 }
 0x198   :  { %328 = vsyncpa [#allocation8 + $0x1], 1 }

</bundles_post_ra>
